<compile_context>
chip_gen: v7x
topology: tpu7x:2x2x1
jax: 0.10.0
libtpu: 0.0.40
codegen_flags: <defaults>
</compile_context>

<pallas_src>
import jax
import jax.numpy as jnp
from jax.experimental import pallas as pl
from jax.experimental.pallas import tpu as pltpu


def _cdiv(a, b):
    return -(-a // b)


def _round_up(x, m):
    return ((x + m - 1) // m) * m


def _make_kernel(tb, tt, t_total, needs_col_mask):
    """Build the per-tile kernel; all tiling parameters are Python-static."""
    lane_chunks = tt // 128
    lane_path = lane_chunks > 0 and (tt % 128 == 0)
    if not lane_path:
        # lane_path is only false when tt == T (single full-extent column
        # block), in which case there is never a column tail to mask.
        assert not needs_col_mask
    # Chunks strictly below this index are fully valid for every column block,
    # so only the tail chunks of the (single) ragged block pay for the mask.
    first_masked = ((t_total % tt) // 128) if needs_col_mask else lane_chunks

    def kernel(inp_ref, out_ref):
        if lane_path:
            if needs_col_mask:
                j = pl.program_id(1)
                valid = t_total - j * tt          # >= tt for all but the last block
                base_col = jax.lax.broadcasted_iota(jnp.int32, (tb, 128), 1)
            acc = None
            # Static unroll: each step is a lane-aligned (tb, 128) chunk load,
            # cast and elementwise vreg add -- pure VPU, pipelines under DMA.
            for c in range(lane_chunks):
                xc = inp_ref[:, c * 128:(c + 1) * 128].astype(jnp.float32)
                if needs_col_mask and c >= first_masked:
                    xc = jnp.where(base_col + (c * 128) < valid, xc, 0.0)
                acc = xc if acc is None else acc + xc
            out_ref[...] = acc                    # (tb, 128) lane-partial sums
        else:
            # Tiny / odd T (< one vreg of lanes, single column block): a plain
            # per-row reduce of the full-extent tile is fine.
            x = inp_ref[...].astype(jnp.float32)
            out_ref[...] = jnp.sum(x, axis=1, keepdims=True)

    out_lanes = 128 if lane_path else 1
    return kernel, out_lanes


def reward_criterion(inp, seq, reward, *, tile_b=512, tile_t=4096, input_buffers=2):
    """Pallas equivalent of RewardCriterion.forward(input, seq, reward)."""
    del seq  # unused in the forward pass, same as the PyTorch module
    B, T = inp.shape
    itemsize = jnp.dtype(inp.dtype).itemsize

    # --- tile selection: alignment + generation-aware VMEM budget ------------
    tile_b = max(8, (tile_b // 8) * 8)
    # Keep one input block <= 12 MiB so the double-buffered footprint stays
    # <= ~24 MiB under the 32 MiB scoped-VMEM limit (safe on v5e/v6e/v7x).
    max_tt = max(128, ((12 * 1024 * 1024 // itemsize) // tile_b) // 128 * 128)
    tile_t = max(128, min((tile_t // 128) * 128, max_tt))

    tt = T if T <= tile_t else tile_t             # full extent or 128-aligned tile
    nt = _cdiv(T, tt)

    if B <= tile_b:
        if nt == 1 and B >= 16:
            # Degenerate (1, 1) grid would idle one v7x TensorCore: split the
            # rows into two 8-aligned blocks so both cores stream HBM.
            tb = _round_up(_cdiv(B, 2), 8)
        else:
            tb = B                                # full extent, always legal
    else:
        tb = tile_b                               # multiple of 8
    nb = _cdiv(B, tb)

    needs_col_mask = (T % tt) != 0
    kernel, out_lanes = _make_kernel(tb, tt, T, needs_col_mask)

    in_spec_kwargs = {}
    if input_buffers != 2:
        # Optional deeper pipelining if DMA is still exposed at small grids.
        in_spec_kwargs["pipeline_mode"] = pl.Buffered(input_buffers)

    partials = pl.pallas_call(
        kernel,
        out_shape=jax.ShapeDtypeStruct((nb, nt, tb, out_lanes), jnp.float32),
        grid=(nb, nt),
        in_specs=[pl.BlockSpec((tb, tt), lambda i, j: (i, j), **in_spec_kwargs)],
        out_specs=pl.BlockSpec((None, None, tb, out_lanes),
                               lambda i, j: (i, j, 0, 0)),
        compiler_params=pltpu.CompilerParams(
            dimension_semantics=("parallel", "parallel"),
            vmem_limit_bytes=32 * 1024 * 1024,
        ),
    )(inp)

    # Tiny epilogue on the (nb, nt, tb, out_lanes) partials: sum column blocks
    # and lanes, drop padded tail rows, apply reward once per row, and fold the
    # negation + mean divisor into a single scalar scale.
    row_sums = jnp.sum(partials, axis=(1, 3)).reshape(nb * tb)[:B]
    reward_f32 = jnp.reshape(reward, (B,)).astype(jnp.float32)
    return jnp.dot(row_sums, reward_f32) * (-1.0 / float(B * T))


def _reference(inp, seq, reward):
    del seq
    return jnp.mean(-inp.astype(jnp.float32) * reward.astype(jnp.float32)[:, None])


if __name__ == "__main__":
    key = jax.random.PRNGKey(0)
    k1, k2, k3 = jax.random.split(key, 3)

    # Small shapes consistent with the module: (B, T) log-probs + (B,) rewards.
    B, T = 8, 16
    inp = jax.random.normal(k1, (B, T), dtype=jnp.float32)
    seq = jax.random.randint(k2, (B, T), 0, 100, dtype=jnp.int32)  # unused
    reward = jax.random.normal(k3, (B,), dtype=jnp.float32)

    out = jax.block_until_ready(reward_criterion(inp, seq, reward))
    ref = _reference(inp, seq, reward)
    assert jnp.allclose(out, ref, atol=1e-5, rtol=1e-5), (out, ref)

    # bf16 case exercising the lane-chunk reduce, the in-kernel bf16->f32 cast
    # and the 2-row-block split (both v7x cores get a parallel program).
    k4, k5, k6 = jax.random.split(k3, 3)
    B2, T2 = 512, 2048
    inp2 = jax.random.normal(k4, (B2, T2), dtype=jnp.bfloat16)
    seq2 = jax.random.randint(k5, (B2, T2), 0, 100, dtype=jnp.int32)  # unused
    reward2 = jax.random.normal(k6, (B2,), dtype=jnp.float32)

    out2 = jax.block_until_ready(reward_criterion(inp2, seq2, reward2))
    ref2 = _reference(inp2, seq2, reward2)
    assert jnp.allclose(out2, ref2, atol=1e-4, rtol=1e-3), (out2, ref2)

    # Ragged case (no padding anywhere): small explicit tiles force a partial
    # last row block (dropped rows) and a masked partial last column block.
    k7, k8, k9 = jax.random.split(k6, 3)
    B3, T3 = 20, 300
    inp3 = jax.random.normal(k7, (B3, T3), dtype=jnp.float32)
    seq3 = jax.random.randint(k8, (B3, T3), 0, 100, dtype=jnp.int32)  # unused
    reward3 = jax.random.normal(k9, (B3,), dtype=jnp.float32)

    out3 = jax.block_until_ready(
        reward_criterion(inp3, seq3, reward3, tile_b=8, tile_t=256))
    ref3 = _reference(inp3, seq3, reward3)
    assert jnp.allclose(out3, ref3, atol=1e-5, rtol=1e-5), (out3, ref3)

    print("KERNEL_OK")
</pallas_src>

<mosaic_0001>
module attributes {stable_mosaic.version = 11 : i64} {
  func.func @kernel(%arg0: i32, %arg1: i32, %arg2: memref<8x16xf32, #tpu.memory_space<vmem>>, %arg3: memref<1x1x8x1xf32, #tpu.memory_space<vmem>>) attributes {dimension_semantics = [#tpu.dimension_semantics<parallel>, #tpu.dimension_semantics<parallel>], iteration_bounds = array<i64: 1, 1>, scalar_prefetch = 0 : i64, scratch_operands = 0 : i64, tpu.core_type = #tpu.core_type<tc>, window_params = [{transform_indices = @transform_0, window_bounds = array<i64: 8, 16>}, {transform_indices = @transform_1, window_bounds = array<i64: 1, 1, 8, 1>}]} {
    %c0 = arith.constant 0 : index
    %c0_0 = arith.constant 0 : index
    %0 = vector.load %arg2[%c0, %c0_0] : memref<8x16xf32, #tpu.memory_space<vmem>>, vector<8x16xf32>
    %cst = arith.constant dense<0.000000e+00> : vector<8xf32>
    %1 = vector.multi_reduction <add>, %0, %cst [1] : vector<8x16xf32> to vector<8xf32>
    %2 = vector.shape_cast %1 : vector<8xf32> to vector<8x1xf32>
    %c0_1 = arith.constant 0 : index
    %c0_2 = arith.constant 0 : index
    %c0_3 = arith.constant 0 : index
    %c0_4 = arith.constant 0 : index
    %3 = vector.load %arg3[%c0_1, %c0_2, %c0_3, %c0_4] : memref<1x1x8x1xf32, #tpu.memory_space<vmem>>, vector<1x1x8x1xf32>
    %4 = vector.shape_cast %3 : vector<1x1x8x1xf32> to vector<8x1xf32>
    %5 = vector.shape_cast %2 : vector<8x1xf32> to vector<1x1x8x1xf32>
    tpu.vector_store %arg3[%c0_1, %c0_2, %c0_3, %c0_4], %5 {strides = array<i32>} : memref<1x1x8x1xf32, #tpu.memory_space<vmem>>, vector<1x1x8x1xf32>,
    return
  }
  func.func @transform_0(%arg0: i32, %arg1: i32) -> (i32, i32) {
    %c0_i32 = arith.constant 0 : i32
    return %arg0, %arg1 : i32, i32
  }
  func.func @transform_1(%arg0: i32, %arg1: i32) -> (i32, i32, i32, i32) {
    %c0_i32 = arith.constant 0 : i32
    %c0_i32_0 = arith.constant 0 : i32
    %c0_i32_1 = arith.constant 0 : i32
    return %arg0, %arg1, %c0_i32, %c0_i32_0 : i32, i32, i32, i32
  }
}

</mosaic_0001>

<bundles_post_ra>
// kernel: tpu_custom_call.1
= control target key start
LH: loop header
LB: loop body
LE: loop exit
PB: predicated region body
PF: predicated region fallthrough
CT: control target
= control target key end

     0   :  { %6 = vsyncpa [#allocation3], 0  ;;  %s57_s6 = smov [#allocation2]   ;;  %s83_s0 = inlined_call_operand.hbm [shape: f32[8,16], index: 0, kind: input, shape index: {}]   ;;  %s84_s1 = inlined_call_operand.vmem [shape: f32[1,1,8,1], index: 1, kind: output, shape index: {}]  }
   0x1   :  { %s13_s7 = sshll.u32 %s57_s6, 4  ;;  %s33_s10 = scalar_lea.hbm %s83_s0, 128  ;;  %s14_s7 = int_to_ptr.vmem [resolvable:$true] %s13_s7 }
   0x2   :  { %p34_p0 = scmp.ne.s32.totalorder %s83_s0, %s33_s10  ;;  %p37_p1 = scmp.lt.u32.totalorder %s33_s10, %s83_s0 }
   0x4   :  { %p39_p2 = pnand %p37_p1, %p34_p0 }
   0x6   :  { %42 = shalt.err (!%p39_p2)
}
   0x7   :  { %s43_s15 = scalar_lea.vmem %s14_s7, 128  ;;  %p48_p4 = scmp.lt.s32.totalorder %s14_s7, %s14_s7 }
   0x8   :  { %p44_p3 = scmp.ne.s32.totalorder %s14_s7, %s43_s15  ;;  %p49_p5 = scmp.lt.s32.totalorder %s43_s15, %s43_s15 }
   0xa   :  { %p50_p6 = por %p49_p5, %p48_p4 }
   0xc   :  { %p51_p7 = pnand %p50_p6, %p44_p3 }
   0xe   :  { %54 = shalt.err (!%p51_p7)
}
   0xf   :  { %16 = dma.hbm_to_vmem [thread:$0]  %s83_s0, 128, %s14_s7, [#allocation3]  }
  0x10   :  { %55 = dma.done.wait [#allocation3], 128  }
  0x11   :  { %56 = vsyncadd [#allocation3], 4294967168  ;;  %vm21_vm0 = vcmask 130048   ;;  %v20_v0 = vld [vmem:[#allocation2] sm:$0xff]  ;;  %vm25_vm1 = vcmask 7168  }
  0x12   :  { %v22_v1 = vsel %vm21_vm0, %v20_v0, 0.0 }
  0x13   :  { %23 = vadd.xlane.f32.xlu0 %v22_v1 }
  0xa0   :  { %v24_v2 = vpop.xlane.xlu0 %23 }
  0xa1   :  { %26 = vst.msk [vmem:[%s84_s1] sm:$0xff] %vm25_vm1, %v24_v2 }
  0xa2   :  { %31 = vsyncpa [#allocation3], 1 }

</bundles_post_ra>
